<compile_context>
chip_gen: v6e
topology: v6e:2x2x1
jax: 0.10.0
libtpu: 0.0.40
codegen_flags: <defaults>
</compile_context>

<pallas_src>
import functools

import jax
import jax.numpy as jnp
from jax.experimental import pallas as pl
from jax.experimental.pallas import tpu as pltpu


def _round_up(x, m):
    return ((x + m - 1) // m) * m


def _cdiv(a, b):
    return -(-a // b)


def _choose_tiling(batch, cap=1024):
    """Pick (tile_b, b_pad).

    - multiple-of-8 tiles (sublane alignment)
    - >=2 grid steps when the batch allows it (v7x megacore sharding)
    - padding overhead bounded by n_steps * 8 rows (no near-doubling for
      awkward batch sizes like B=260)
    - tile_b <= cap so v5e's 16 MiB scoped-VMEM default is never an issue.
    """
    b8 = _round_up(max(batch, 1), 8)
    min_steps = 2 if b8 >= 16 else 1
    n_steps = max(min_steps, _cdiv(b8, cap))
    tile_b = _round_up(_cdiv(b8, n_steps), 8)
    return tile_b, n_steps * tile_b


def critic_kernel(num_actions,
                  obs_ref, feat_ref,
                  w0o_ref, w0f_ref, b0a_ref,
                  w0b_ref, b0b_ref,
                  w1_ref, b1_ref,
                  w2_ref, b2_ref,
                  wva_ref, bva_ref,
                  q_ref):
    cd = w0o_ref.dtype  # matmul compute dtype (bf16); accumulation is f32

    # fc0 layer 1: Linear(N*4 + 8, 128) + ReLU, with the torch.cat fused into a
    # split-K matmul (obs part + feat part share the same batch tile).
    x = (jnp.dot(obs_ref[...], w0o_ref[...], preferred_element_type=jnp.float32)
         + jnp.dot(feat_ref[...], w0f_ref[...], preferred_element_type=jnp.float32)
         + b0a_ref[...])
    x = jnp.maximum(x, 0.0)

    # fc0 layer 2: Linear(128, 256) + ReLU
    x = jnp.maximum(
        jnp.dot(x.astype(cd), w0b_ref[...], preferred_element_type=jnp.float32)
        + b0b_ref[...], 0.0)

    # fc1: Linear(256, 256) + ReLU
    x = jnp.maximum(
        jnp.dot(x.astype(cd), w1_ref[...], preferred_element_type=jnp.float32)
        + b1_ref[...], 0.0)

    # fc2: Linear(256, hid2) + ReLU, lane-padded to 128 outputs.  Padded lanes
    # are ReLU(0 + 0) = 0 and hit zero rows of the head weight below.
    x = jnp.maximum(
        jnp.dot(x.astype(cd), w2_ref[...], preferred_element_type=jnp.float32)
        + b2_ref[...], 0.0)

    # Fused dueling heads: lane 0 = value, lanes 1 .. 1+A = adv, rest zero.
    y = (jnp.dot(x.astype(cd), wva_ref[...], preferred_element_type=jnp.float32)
         + bva_ref[...])
    val = y[:, 0:1]
    adv = y[:, 1:1 + num_actions]
    adv_mean = jnp.sum(adv, axis=1, keepdims=True) * (1.0 / num_actions)

    # Store only the num_actions q-value lanes (tiny writeback).
    q_ref[...] = adv + (val - adv_mean)


def prepare_critic_params(params, obs_dim, compute_dtype=jnp.bfloat16):
    """One-time weight repacking (hoisted out of the per-call hot path)."""
    cd = compute_dtype
    hid2 = params["wa"].shape[0]
    num_actions = params["wa"].shape[1]
    in_dim = params["w0a"].shape[0]
    feat_dim = in_dim - obs_dim

    hid2_pad = max(128, _round_up(hid2, 128))
    head_lanes = max(128, _round_up(1 + num_actions, 128))

    # Split the first-layer weight so the concat happens inside the matmul.
    w0o = params["w0a"][:obs_dim].astype(cd)
    w0f = params["w0a"][obs_dim:].astype(cd)

    # fc2 padded to hid2_pad lanes.
    w2 = jnp.zeros((params["w2"].shape[0], hid2_pad), jnp.float32)
    w2 = w2.at[:, :hid2].set(params["w2"])
    b2 = jnp.zeros((1, hid2_pad), jnp.float32).at[:, :hid2].set(params["b2"])

    # Fused value + adv heads: (hid2_pad, head_lanes) lane-dense weight.
    wva = jnp.zeros((hid2_pad, head_lanes), jnp.float32)
    wva = (wva.at[:hid2, 0:1].set(params["wv"])
              .at[:hid2, 1:1 + num_actions].set(params["wa"]))
    bva = jnp.zeros((1, head_lanes), jnp.float32)
    bva = (bva.at[:, 0:1].set(params["bv"])
              .at[:, 1:1 + num_actions].set(params["ba"]))

    weights = (
        w0o, w0f, params["b0a"].astype(jnp.float32),
        params["w0b"].astype(cd), params["b0b"].astype(jnp.float32),
        params["w1"].astype(cd), params["b1"].astype(jnp.float32),
        w2.astype(cd), b2,
        wva.astype(cd), bva,
    )
    return {
        "weights": weights,
        "obs_dim": obs_dim,
        "feat_dim": feat_dim,
        "num_actions": num_actions,
        "compute_dtype": cd,
    }


def critic_forward(obs, feat, prepped):
    B = obs.shape[0]
    cd = prepped["compute_dtype"]
    num_actions = prepped["num_actions"]
    weights = prepped["weights"]

    obs_flat = obs.reshape(B, -1).astype(cd)
    feat_c = feat.reshape(B, -1).astype(cd)
    obs_dim = obs_flat.shape[1]
    feat_dim = feat_c.shape[1]
    assert obs_dim == prepped["obs_dim"] and feat_dim == prepped["feat_dim"]

    tile_b, b_pad = _choose_tiling(B)
    if b_pad != B:
        obs_flat = jnp.pad(obs_flat, ((0, b_pad - B), (0, 0)))
        feat_c = jnp.pad(feat_c, ((0, b_pad - B), (0, 0)))

    def batch_spec(last_dim):
        return pl.BlockSpec((tile_b, last_dim), lambda i: (i, 0))

    def const_spec(arr):
        # Full-array block, constant index -> VMEM-resident, no re-DMA.
        return pl.BlockSpec(arr.shape, lambda i: (0, 0))

    q_pad = pl.pallas_call(
        functools.partial(critic_kernel, num_actions),
        out_shape=jax.ShapeDtypeStruct((b_pad, num_actions), jnp.float32),
        grid=(b_pad // tile_b,),
        in_specs=[batch_spec(obs_dim), batch_spec(feat_dim)]
                 + [const_spec(w) for w in weights],
        out_specs=pl.BlockSpec((tile_b, num_actions), lambda i: (i, 0)),
        compiler_params=pltpu.CompilerParams(
            dimension_semantics=("parallel",)),
    )(obs_flat, feat_c, *weights)

    return q_pad[:B]


def _linear_params(key, fan_in, fan_out):
    # PyTorch nn.Linear default init: U(-1/sqrt(fan_in), 1/sqrt(fan_in))
    kw, kb = jax.random.split(key)
    bound = 1.0 / jnp.sqrt(jnp.float32(fan_in))
    w = jax.random.uniform(kw, (fan_in, fan_out), jnp.float32, -bound, bound)
    b = jax.random.uniform(kb, (1, fan_out), jnp.float32, -bound, bound)
    return w, b


def make_params(key, in_dim, obs_n, num_actions):
    keys = jax.random.split(key, 6)
    hid2 = obs_n * 2
    p = {}
    p["w0a"], p["b0a"] = _linear_params(keys[0], in_dim, 128)
    p["w0b"], p["b0b"] = _linear_params(keys[1], 128, 256)
    p["w1"], p["b1"] = _linear_params(keys[2], 256, 256)
    p["w2"], p["b2"] = _linear_params(keys[3], 256, hid2)
    p["wv"], p["bv"] = _linear_params(keys[4], hid2, 1)
    p["wa"], p["ba"] = _linear_params(keys[5], hid2, num_actions)
    return p


def _reference(obs, feat, params, compute_dtype=jnp.bfloat16):
    # Pure-JAX reference mirroring the PyTorch module, with the same
    # bf16-input / f32-accumulate matmul convention as the kernel.
    cd = compute_dtype
    B = obs.shape[0]
    h = jnp.concatenate([obs.reshape(B, -1), feat.reshape(B, -1)], axis=-1)

    def dense(x, w, b):
        return jnp.dot(x.astype(cd), w.astype(cd),
                       preferred_element_type=jnp.float32) + b

    x = jnp.maximum(dense(h, params["w0a"], params["b0a"]), 0.0)
    x = jnp.maximum(dense(x, params["w0b"], params["b0b"]), 0.0)
    x = jnp.maximum(dense(x, params["w1"], params["b1"]), 0.0)
    x = jnp.maximum(dense(x, params["w2"], params["b2"]), 0.0)
    adv = dense(x, params["wa"], params["ba"])
    val = dense(x, params["wv"], params["bv"])
    return val + adv - jnp.mean(adv, axis=1, keepdims=True)


if __name__ == "__main__":
    # Shapes consistent with the module:
    #   args.N = 6  -> first Linear input dim = N*4 + 8 = 32
    #   obs_space = (N, 4) -> obs (B, 6, 4); feat (B, 8); num_actions = 5
    N, num_actions = 6, 5
    in_dim = N * 4 + 8
    obs_dim = N * 4

    key = jax.random.PRNGKey(0)
    k_par, k1, k2, k3, k4 = jax.random.split(key, 5)
    params = make_params(k_par, in_dim, N, num_actions)
    prepped = prepare_critic_params(params, obs_dim)

    ok = True
    for B, ko, kf in [(2, k1, k2), (37, k3, k4)]:
        obs = jax.random.normal(ko, (B, N, 4), jnp.float32)
        feat = jax.random.normal(kf, (B, 8), jnp.float32)

        q = critic_forward(obs, feat, prepped)
        q = jax.block_until_ready(q)

        q_ref = _reference(obs, feat, params)
        assert q.shape == (B, num_actions), q.shape
        err = jnp.max(jnp.abs(q - q_ref))
        assert jnp.allclose(q, q_ref, atol=2e-2, rtol=2e-2), err
        ok = ok and bool(jnp.isfinite(err))

    if ok:
        print("KERNEL_OK")
</pallas_src>

<mosaic_0001>
module attributes {stable_mosaic.version = 11 : i64} {
  func.func @critic_kernel(%arg0: i32, %arg1: memref<8x24xbf16, #tpu.memory_space<vmem>>, %arg2: memref<8x8xbf16, #tpu.memory_space<vmem>>, %arg3: memref<24x128xbf16, #tpu.memory_space<vmem>>, %arg4: memref<8x128xbf16, #tpu.memory_space<vmem>>, %arg5: memref<1x128xf32, #tpu.memory_space<vmem>>, %arg6: memref<128x256xbf16, #tpu.memory_space<vmem>>, %arg7: memref<1x256xf32, #tpu.memory_space<vmem>>, %arg8: memref<256x256xbf16, #tpu.memory_space<vmem>>, %arg9: memref<1x256xf32, #tpu.memory_space<vmem>>, %arg10: memref<256x128xbf16, #tpu.memory_space<vmem>>, %arg11: memref<1x128xf32, #tpu.memory_space<vmem>>, %arg12: memref<128x128xbf16, #tpu.memory_space<vmem>>, %arg13: memref<1x128xf32, #tpu.memory_space<vmem>>, %arg14: memref<8x5xf32, #tpu.memory_space<vmem>>) attributes {dimension_semantics = [#tpu.dimension_semantics<parallel>], iteration_bounds = array<i64: 1>, scalar_prefetch = 0 : i64, scratch_operands = 0 : i64, tpu.core_type = #tpu.core_type<tc>, window_params = [{transform_indices = @transform_0, window_bounds = array<i64: 8, 24>}, {transform_indices = @transform_1, window_bounds = array<i64: 8, 8>}, {pipeline_mode = #tpu.pipeline_mode<synchronous>, transform_indices = @transform_2, window_bounds = array<i64: 24, 128>}, {pipeline_mode = #tpu.pipeline_mode<synchronous>, transform_indices = @transform_3, window_bounds = array<i64: 8, 128>}, {pipeline_mode = #tpu.pipeline_mode<synchronous>, transform_indices = @transform_4, window_bounds = array<i64: 1, 128>}, {pipeline_mode = #tpu.pipeline_mode<synchronous>, transform_indices = @transform_5, window_bounds = array<i64: 128, 256>}, {pipeline_mode = #tpu.pipeline_mode<synchronous>, transform_indices = @transform_6, window_bounds = array<i64: 1, 256>}, {pipeline_mode = #tpu.pipeline_mode<synchronous>, transform_indices = @transform_7, window_bounds = array<i64: 256, 256>}, {pipeline_mode = #tpu.pipeline_mode<synchronous>, transform_indices = @transform_8, window_bounds = array<i64: 1, 256>}, {pipeline_mode = #tpu.pipeline_mode<synchronous>, transform_indices = @transform_9, window_bounds = array<i64: 256, 128>}, {pipeline_mode = #tpu.pipeline_mode<synchronous>, transform_indices = @transform_10, window_bounds = array<i64: 1, 128>}, {pipeline_mode = #tpu.pipeline_mode<synchronous>, transform_indices = @transform_11, window_bounds = array<i64: 128, 128>}, {pipeline_mode = #tpu.pipeline_mode<synchronous>, transform_indices = @transform_12, window_bounds = array<i64: 1, 128>}, {transform_indices = @transform_13, window_bounds = array<i64: 8, 5>}]} {
    %c0 = arith.constant 0 : index
    %c0_0 = arith.constant 0 : index
    %0 = vector.load %arg1[%c0, %c0_0] : memref<8x24xbf16, #tpu.memory_space<vmem>>, vector<8x24xbf16>
    %c0_1 = arith.constant 0 : index
    %c0_2 = arith.constant 0 : index
    %1 = vector.load %arg3[%c0_1, %c0_2] : memref<24x128xbf16, #tpu.memory_space<vmem>>, vector<24x128xbf16>
    %cst = arith.constant dense<0.000000e+00> : vector<8x128xf32>
    %2 = tpu.matmul %0, %1, %cst {dimension_numbers = #tpu.dot_dimension_numbers<[1], [0], [0], [1], [0, 0, 1, 1], [], []>} : vector<8x24xbf16>, vector<24x128xbf16>, vector<8x128xf32> -> vector<8x128xf32>
    %c0_3 = arith.constant 0 : index
    %c0_4 = arith.constant 0 : index
    %3 = vector.load %arg2[%c0_3, %c0_4] : memref<8x8xbf16, #tpu.memory_space<vmem>>, vector<8x8xbf16>
    %c0_5 = arith.constant 0 : index
    %c0_6 = arith.constant 0 : index
    %4 = vector.load %arg4[%c0_5, %c0_6] : memref<8x128xbf16, #tpu.memory_space<vmem>>, vector<8x128xbf16>
    %cst_7 = arith.constant dense<0.000000e+00> : vector<8x128xf32>
    %5 = tpu.matmul %3, %4, %cst_7 {dimension_numbers = #tpu.dot_dimension_numbers<[1], [0], [0], [1], [0, 0, 1, 1], [], []>} : vector<8x8xbf16>, vector<8x128xbf16>, vector<8x128xf32> -> vector<8x128xf32>
    %6 = arith.addf %2, %5 : vector<8x128xf32>
    %c0_8 = arith.constant 0 : index
    %c0_9 = arith.constant 0 : index
    %7 = vector.load %arg5[%c0_8, %c0_9] : memref<1x128xf32, #tpu.memory_space<vmem>>, vector<1x128xf32>
    %8 = vector.broadcast %7 : vector<1x128xf32> to vector<8x128xf32>
    %9 = arith.addf %6, %8 : vector<8x128xf32>
    %cst_10 = arith.constant 0.000000e+00 : f32
    %10 = vector.broadcast %cst_10 : f32 to vector<8x128xf32>
    %11 = arith.maximumf %9, %10 : vector<8x128xf32>
    %12 = arith.truncf %11 : vector<8x128xf32> to vector<8x128xbf16>
    %c0_11 = arith.constant 0 : index
    %c0_12 = arith.constant 0 : index
    %13 = vector.load %arg6[%c0_11, %c0_12] : memref<128x256xbf16, #tpu.memory_space<vmem>>, vector<128x256xbf16>
    %cst_13 = arith.constant dense<0.000000e+00> : vector<8x256xf32>
    %14 = tpu.matmul %12, %13, %cst_13 {dimension_numbers = #tpu.dot_dimension_numbers<[1], [0], [0], [1], [0, 0, 1, 1], [], []>} : vector<8x128xbf16>, vector<128x256xbf16>, vector<8x256xf32> -> vector<8x256xf32>
    %c0_14 = arith.constant 0 : index
    %c0_15 = arith.constant 0 : index
    %15 = vector.load %arg7[%c0_14, %c0_15] : memref<1x256xf32, #tpu.memory_space<vmem>>, vector<1x256xf32>
    %16 = vector.broadcast %15 : vector<1x256xf32> to vector<8x256xf32>
    %17 = arith.addf %14, %16 : vector<8x256xf32>
    %cst_16 = arith.constant 0.000000e+00 : f32
    %18 = vector.broadcast %cst_16 : f32 to vector<8x256xf32>
    %19 = arith.maximumf %17, %18 : vector<8x256xf32>
    %20 = arith.truncf %19 : vector<8x256xf32> to vector<8x256xbf16>
    %c0_17 = arith.constant 0 : index
    %c0_18 = arith.constant 0 : index
    %21 = vector.load %arg8[%c0_17, %c0_18] : memref<256x256xbf16, #tpu.memory_space<vmem>>, vector<256x256xbf16>
    %cst_19 = arith.constant dense<0.000000e+00> : vector<8x256xf32>
    %22 = tpu.matmul %20, %21, %cst_19 {dimension_numbers = #tpu.dot_dimension_numbers<[1], [0], [0], [1], [0, 0, 1, 1], [], []>} : vector<8x256xbf16>, vector<256x256xbf16>, vector<8x256xf32> -> vector<8x256xf32>
    %c0_20 = arith.constant 0 : index
    %c0_21 = arith.constant 0 : index
    %23 = vector.load %arg9[%c0_20, %c0_21] : memref<1x256xf32, #tpu.memory_space<vmem>>, vector<1x256xf32>
    %24 = vector.broadcast %23 : vector<1x256xf32> to vector<8x256xf32>
    %25 = arith.addf %22, %24 : vector<8x256xf32>
    %cst_22 = arith.constant 0.000000e+00 : f32
    %26 = vector.broadcast %cst_22 : f32 to vector<8x256xf32>
    %27 = arith.maximumf %25, %26 : vector<8x256xf32>
    %28 = arith.truncf %27 : vector<8x256xf32> to vector<8x256xbf16>
    %c0_23 = arith.constant 0 : index
    %c0_24 = arith.constant 0 : index
    %29 = vector.load %arg10[%c0_23, %c0_24] : memref<256x128xbf16, #tpu.memory_space<vmem>>, vector<256x128xbf16>
    %cst_25 = arith.constant dense<0.000000e+00> : vector<8x128xf32>
    %30 = tpu.matmul %28, %29, %cst_25 {dimension_numbers = #tpu.dot_dimension_numbers<[1], [0], [0], [1], [0, 0, 1, 1], [], []>} : vector<8x256xbf16>, vector<256x128xbf16>, vector<8x128xf32> -> vector<8x128xf32>
    %c0_26 = arith.constant 0 : index
    %c0_27 = arith.constant 0 : index
    %31 = vector.load %arg11[%c0_26, %c0_27] : memref<1x128xf32, #tpu.memory_space<vmem>>, vector<1x128xf32>
    %32 = vector.broadcast %31 : vector<1x128xf32> to vector<8x128xf32>
    %33 = arith.addf %30, %32 : vector<8x128xf32>
    %cst_28 = arith.constant 0.000000e+00 : f32
    %34 = vector.broadcast %cst_28 : f32 to vector<8x128xf32>
    %35 = arith.maximumf %33, %34 : vector<8x128xf32>
    %36 = arith.truncf %35 : vector<8x128xf32> to vector<8x128xbf16>
    %c0_29 = arith.constant 0 : index
    %c0_30 = arith.constant 0 : index
    %37 = vector.load %arg12[%c0_29, %c0_30] : memref<128x128xbf16, #tpu.memory_space<vmem>>, vector<128x128xbf16>
    %cst_31 = arith.constant dense<0.000000e+00> : vector<8x128xf32>
    %38 = tpu.matmul %36, %37, %cst_31 {dimension_numbers = #tpu.dot_dimension_numbers<[1], [0], [0], [1], [0, 0, 1, 1], [], []>} : vector<8x128xbf16>, vector<128x128xbf16>, vector<8x128xf32> -> vector<8x128xf32>
    %c0_32 = arith.constant 0 : index
    %c0_33 = arith.constant 0 : index
    %39 = vector.load %arg13[%c0_32, %c0_33] : memref<1x128xf32, #tpu.memory_space<vmem>>, vector<1x128xf32>
    %40 = vector.broadcast %39 : vector<1x128xf32> to vector<8x128xf32>
    %41 = arith.addf %38, %40 : vector<8x128xf32>
    %42 = vector.extract_strided_slice %41 {offsets = [0, 0], sizes = [8, 1], strides = [1, 1]} : vector<8x128xf32> to vector<8x1xf32>
    %43 = vector.extract_strided_slice %41 {offsets = [0, 1], sizes = [8, 5], strides = [1, 1]} : vector<8x128xf32> to vector<8x5xf32>
    %cst_34 = arith.constant dense<0.000000e+00> : vector<8xf32>
    %44 = vector.multi_reduction <add>, %43, %cst_34 [1] : vector<8x5xf32> to vector<8xf32>
    %45 = vector.shape_cast %44 : vector<8xf32> to vector<8x1xf32>
    %cst_35 = arith.constant 2.000000e-01 : f32
    %46 = vector.broadcast %cst_35 : f32 to vector<8x1xf32>
    %47 = arith.mulf %45, %46 : vector<8x1xf32>
    %48 = arith.subf %42, %47 : vector<8x1xf32>
    %49 = vector.broadcast %48 : vector<8x1xf32> to vector<8x5xf32>
    %50 = arith.addf %43, %49 : vector<8x5xf32>
    %c0_36 = arith.constant 0 : index
    %c0_37 = arith.constant 0 : index
    %51 = vector.load %arg14[%c0_36, %c0_37] : memref<8x5xf32, #tpu.memory_space<vmem>>, vector<8x5xf32>
    tpu.vector_store %arg14[%c0_36, %c0_37], %50 {strides = array<i32>} : memref<8x5xf32, #tpu.memory_space<vmem>>, vector<8x5xf32>,
    return
  }
  func.func @transform_0(%arg0: i32) -> (i32, i32) {
    %c0_i32 = arith.constant 0 : i32
    %c0_i32_0 = arith.constant 0 : i32
    return %arg0, %c0_i32 : i32, i32
  }
  func.func @transform_1(%arg0: i32) -> (i32, i32) {
    %c0_i32 = arith.constant 0 : i32
    %c0_i32_0 = arith.constant 0 : i32
    return %arg0, %c0_i32 : i32, i32
  }
  func.func @transform_2(%arg0: i32) -> (i32, i32) {
    %c0_i32 = arith.constant 0 : i32
    %c0_i32_0 = arith.constant 0 : i32
    %c0_i32_1 = arith.constant 0 : i32
    return %c0_i32, %c0_i32_0 : i32, i32
  }
  func.func @transform_3(%arg0: i32) -> (i32, i32) {
    %c0_i32 = arith.constant 0 : i32
    %c0_i32_0 = arith.constant 0 : i32
    %c0_i32_1 = arith.constant 0 : i32
    return %c0_i32, %c0_i32_0 : i32, i32
  }
  func.func @transform_4(%arg0: i32) -> (i32, i32) {
    %c0_i32 = arith.constant 0 : i32
    %c0_i32_0 = arith.constant 0 : i32
    %c0_i32_1 = arith.constant 0 : i32
    return %c0_i32, %c0_i32_0 : i32, i32
  }
  func.func @transform_5(%arg0: i32) -> (i32, i32) {
    %c0_i32 = arith.constant 0 : i32
    %c0_i32_0 = arith.constant 0 : i32
    %c0_i32_1 = arith.constant 0 : i32
    return %c0_i32, %c0_i32_0 : i32, i32
  }
  func.func @transform_6(%arg0: i32) -> (i32, i32) {
    %c0_i32 = arith.constant 0 : i32
    %c0_i32_0 = arith.constant 0 : i32
    %c0_i32_1 = arith.constant 0 : i32
    return %c0_i32, %c0_i32_0 : i32, i32
  }
  func.func @transform_7(%arg0: i32) -> (i32, i32) {
    %c0_i32 = arith.constant 0 : i32
    %c0_i32_0 = arith.constant 0 : i32
    %c0_i32_1 = arith.constant 0 : i32
    return %c0_i32, %c0_i32_0 : i32, i32
  }
  func.func @transform_8(%arg0: i32) -> (i32, i32) {
    %c0_i32 = arith.constant 0 : i32
    %c0_i32_0 = arith.constant 0 : i32
    %c0_i32_1 = arith.constant 0 : i32
    return %c0_i32, %c0_i32_0 : i32, i32
  }
  func.func @transform_9(%arg0: i32) -> (i32, i32) {
    %c0_i32 = arith.constant 0 : i32
    %c0_i32_0 = arith.constant 0 : i32
    %c0_i32_1 = arith.constant 0 : i32
    return %c0_i32, %c0_i32_0 : i32, i32
  }
  func.func @transform_10(%arg0: i32) -> (i32, i32) {
    %c0_i32 = arith.constant 0 : i32
    %c0_i32_0 = arith.constant 0 : i32
    %c0_i32_1 = arith.constant 0 : i32
    return %c0_i32, %c0_i32_0 : i32, i32
  }
  func.func @transform_11(%arg0: i32) -> (i32, i32) {
    %c0_i32 = arith.constant 0 : i32
    %c0_i32_0 = arith.constant 0 : i32
    %c0_i32_1 = arith.constant 0 : i32
    return %c0_i32, %c0_i32_0 : i32, i32
  }
  func.func @transform_12(%arg0: i32) -> (i32, i32) {
    %c0_i32 = arith.constant 0 : i32
    %c0_i32_0 = arith.constant 0 : i32
    %c0_i32_1 = arith.constant 0 : i32
    return %c0_i32, %c0_i32_0 : i32, i32
  }
  func.func @transform_13(%arg0: i32) -> (i32, i32) {
    %c0_i32 = arith.constant 0 : i32
    %c0_i32_0 = arith.constant 0 : i32
    return %arg0, %c0_i32 : i32, i32
  }
}

</mosaic_0001>

<bundles_post_ra>
// kernel: tpu_custom_call.1
= control target key start
LH: loop header
LB: loop body
LE: loop exit
PB: predicated region body
PF: predicated region fallthrough
CT: control target
= control target key end

     0   :  { %18 = vsyncpa [#allocation3], 0  ;;  %s1581_s0 = inlined_call_operand.hbm [shape: bf16[8,24], index: 0, kind: input, shape index: {}]   ;;  %s1582_s1 = inlined_call_operand.hbm [shape: bf16[8,8], index: 1, kind: input, shape index: {}]   ;;  %s1583_s2 = inlined_call_operand.hbm [shape: bf16[24,128], index: 2, kind: input, shape index: {}]   ;;  %s1584_s3 = inlined_call_operand.vmem [shape: bf16[8,128], index: 3, kind: input, shape index: {}]   ;;  %s1585_s4 = inlined_call_operand.vmem [shape: f32[1,128], index: 4, kind: input, shape index: {}]   ;;  %s1586_s5 = inlined_call_operand.hbm [shape: bf16[128,256], index: 5, kind: input, shape index: {}]   ;;  %s1587_s6 = inlined_call_operand.vmem [shape: f32[1,256], index: 6, kind: input, shape index: {}]   ;;  %s1588_s7 = inlined_call_operand.hbm [shape: bf16[256,256], index: 7, kind: input, shape index: {}]   ;;  %s1589_s8 = inlined_call_operand.vmem [shape: f32[1,256], index: 8, kind: input, shape index: {}]   ;;  %s1590_s9 = inlined_call_operand.hbm [shape: bf16[256,128], index: 9, kind: input, shape index: {}]   ;;  %s1591_s10 = inlined_call_operand.vmem [shape: f32[1,128], index: 10, kind: input, shape index: {}]   ;;  %s1592_s11 = inlined_call_operand.hbm [shape: bf16[128,128], index: 11, kind: input, shape index: {}]   ;;  %s1593_s12 = inlined_call_operand.vmem [shape: f32[1,128], index: 12, kind: input, shape index: {}]   ;;  %s1594_s13 = inlined_call_operand.hbm [shape: f32[8,5], index: 13, kind: output, shape index: {}]  }
   0x1   :  { %19 = vsyncpa [#allocation6], 0 }
   0x2   :  { %20 = vsyncpa [#allocation9], 0 }
   0x3   :  { %21 = vsyncpa [#allocation12], 0 }
   0x4   :  { %22 = vsyncpa [#allocation4], 0  ;;  %s1421_s25 = smov [#allocation5]   ;;  %s1422_s27 = smov [#allocation8]  }
   0x5   :  { %s39_s26 = sshll.u32 %s1421_s25, 4  ;;  %s64_s28 = sshll.u32 %s1422_s27, 4  ;;  %s40_s26 = int_to_ptr.vmem [resolvable:$true] %s39_s26  ;;  %s65_s28 = int_to_ptr.vmem [resolvable:$true] %s64_s28 }
   0x6   :  { %s1259_s29 = scalar_lea.vmem %s40_s26, 64  ;;  %p1264_p1 = scmp.lt.s32.totalorder %s40_s26, %s40_s26 }
   0x7   :  { %p1260_p0 = scmp.ne.s32.totalorder %s40_s26, %s1259_s29  ;;  %p1265_p2 = scmp.lt.s32.totalorder %s1259_s29, %s1259_s29 }
   0x9   :  { %p1266_p3 = por %p1265_p2, %p1264_p1 }
   0xb   :  { %p1267_p4 = pnand %p1266_p3, %p1260_p0 }
   0xd   :  { %1270 = shalt.err (!%p1267_p4)
}
   0xe   :  { %42 = dma.hbm_to_vmem [thread:$0]  %s1582_s1, 64, %s40_s26, [#allocation6]  }
   0xf   :  { %s1279_s15 = scalar_lea.vmem %s65_s28, 2048  ;;  %p1284_p6 = scmp.lt.s32.totalorder %s65_s28, %s65_s28 }
  0x10   :  { %p1280_p5 = scmp.ne.s32.totalorder %s65_s28, %s1279_s15  ;;  %p1285_p7 = scmp.lt.s32.totalorder %s1279_s15, %s1279_s15 }
  0x12   :  { %p1286_p8 = por %p1285_p7, %p1284_p6 }
  0x14   :  { %p1287_p9 = pnand %p1286_p8, %p1280_p5 }
  0x16   :  { %1290 = shalt.err (!%p1287_p9)
}
  0x17   :  { %s1423_s16 = smov 128   ;;  %s1424_s17 = smov 8  }
  0x18   :  { %70 = dma.hbm_to_vmem [thread:$0]  %s1586_s5, 2048, %s65_s28, [#allocation9], %s1423_s16, %s1423_s16, %s1424_s17  }
  0x19   :  { %s1425_s20 = smov [#allocation11]   ;;  %s1426_s22 = smov [#allocation2]  }
  0x1a   :  { %s92_s21 = sshll.u32 %s1425_s20, 4  ;;  %s29_s1 = sshll.u32 %s1426_s22, 4  ;;  %s93_s21 = int_to_ptr.vmem [resolvable:$true] %s92_s21  ;;  %s30_s1 = int_to_ptr.vmem [resolvable:$true] %s29_s1 }
  0x1b   :  { %s1299_s23 = scalar_lea.vmem %s93_s21, 2048  ;;  %p1304_p11 = scmp.lt.s32.totalorder %s93_s21, %s93_s21 }
  0x1c   :  { %p1300_p10 = scmp.ne.s32.totalorder %s93_s21, %s1299_s23  ;;  %p1305_p12 = scmp.lt.s32.totalorder %s1299_s23, %s1299_s23 }
  0x1e   :  { %p1306_p13 = por %p1305_p12, %p1304_p11 }
  0x20   :  { %p1307_p0 = pnand %p1306_p13, %p1300_p10 }
  0x22   :  { %1310 = shalt.err (!%p1307_p0)
}
  0x23   :  { %s1427_s24 = smov 64   ;;  %s1428_s25 = smov 4  }
  0x24   :  { %98 = dma.hbm_to_vmem [thread:$0]  %s1590_s9, 2048, %s93_s21, [#allocation12], %s1427_s24, %s1427_s24, %s1428_s25  }
  0x25   :  { %s1319_s27 = scalar_lea.vmem %s30_s1, 64  ;;  %p1324_p2 = scmp.lt.s32.totalorder %s30_s1, %s30_s1 }
  0x26   :  { %p1320_p1 = scmp.ne.s32.totalorder %s30_s1, %s1319_s27  ;;  %p1325_p3 = scmp.lt.s32.totalorder %s1319_s27, %s1319_s27 }
  0x28   :  { %p1326_p4 = por %p1325_p3, %p1324_p2 }
  0x2a   :  { %p1327_p5 = pnand %p1326_p4, %p1320_p1 }
  0x2c   :  { %1330 = shalt.err (!%p1327_p5)
}
  0x2d   :  { %32 = dma.hbm_to_vmem [thread:$0]  %s1581_s0, 64, %s30_s1, [#allocation3]  }
  0x2e   :  { %s1429_s30 = smov [#allocation7]   ;;  %s1430_s15 = smov [#allocation10]  }
  0x2f   :  { %s48_s14 = sshll.u32 %s1429_s30, 4  ;;  %s78_s18 = sshll.u32 %s1430_s15, 4  ;;  %s49_s14 = int_to_ptr.vmem [resolvable:$true] %s48_s14  ;;  %s79_s18 = int_to_ptr.vmem [resolvable:$true] %s78_s18 }
  0x30   :  { %s1339_s19 = scalar_lea.vmem %s49_s14, 192  ;;  %p1344_p7 = scmp.lt.s32.totalorder %s49_s14, %s49_s14 }
  0x31   :  { %p1340_p6 = scmp.ne.s32.totalorder %s49_s14, %s1339_s19  ;;  %p1345_p8 = scmp.lt.s32.totalorder %s1339_s19, %s1339_s19 }
  0x33   :  { %p1346_p9 = por %p1345_p8, %p1344_p7 }
  0x35   :  { %p1347_p10 = pnand %p1346_p9, %p1340_p6 }
  0x37   :  { %1350 = shalt.err (!%p1347_p10)
}
  0x38   :  { %54 = dma.hbm_to_vmem [thread:$0]  %s1583_s2, 192, %s49_s14, [#allocation6], %s1427_s24, %s1427_s24, %s1428_s25  }
  0x39   :  { %s1359_s0 = scalar_lea.vmem %s79_s18, 4096  ;;  %p1364_p12 = scmp.lt.s32.totalorder %s79_s18, %s79_s18 }
  0x3a   :  { %p1360_p11 = scmp.ne.s32.totalorder %s79_s18, %s1359_s0  ;;  %p1365_p13 = scmp.lt.s32.totalorder %s1359_s0, %s1359_s0 }
  0x3c   :  { %p1366_p0 = por %p1365_p13, %p1364_p12 }
  0x3e   :  { %p1367_p1 = pnand %p1366_p0, %p1360_p11 }
  0x40   :  { %1370 = shalt.err (!%p1367_p1)
}
  0x41   :  { %84 = dma.hbm_to_vmem [thread:$0]  %s1588_s7, 4096, %s79_s18, [#allocation9], %s1423_s16, %s1423_s16, %s1424_s17  }
  0x42   :  { %s1431_s1 = smov [#allocation13]  }
  0x43   :  { %s106_s23 = sshll.u32 %s1431_s1, 4  ;;  %s107_s23 = int_to_ptr.vmem [resolvable:$true] %s106_s23 }
  0x44   :  { %s1379_s26 = scalar_lea.vmem %s107_s23, 1024  ;;  %p1384_p3 = scmp.lt.s32.totalorder %s107_s23, %s107_s23 }
  0x45   :  { %p1380_p2 = scmp.ne.s32.totalorder %s107_s23, %s1379_s26  ;;  %p1385_p4 = scmp.lt.s32.totalorder %s1379_s26, %s1379_s26 }
  0x47   :  { %p1386_p5 = por %p1385_p4, %p1384_p3 }
  0x49   :  { %p1387_p6 = pnand %p1386_p5, %p1380_p2 }
  0x4b   :  { %1390 = shalt.err (!%p1387_p6)
}
  0x4c   :  { %112 = dma.hbm_to_vmem [thread:$0]  %s1592_s11, 1024, %s107_s23, [#allocation12], %s1427_s24, %s1427_s24, %s1428_s25  }
  0x4d   :  { %1411 = dma.done.wait [#allocation3], 64  }
  0x4e   :  { %1412 = vsyncadd [#allocation3], 4294967232 }
  0x4f   :  { %1413 = dma.done.wait [#allocation6], 256  }
  0x50   :  { %1414 = vsyncadd [#allocation6], 4294967040 }
  0x51   :  { %1415 = dma.done.wait [#allocation9], 6144  }
  0x52   :  { %1416 = vsyncadd [#allocation9], 4294961152 }
  0x53   :  { %1417 = dma.done.wait [#allocation12], 3072  }
  0x54   :  { %1418 = vsyncadd [#allocation12], 4294964224  ;;  %v1432_v0 = vmov 0.0   ;;  %vm1433_vm0 = vmmov 0   ;;  %vm147_vm1 = vcmask 1043456   ;;  %vm143_vm2 = vcmask 64512  }
  0x55   :  { %1101 = vmatprep.subr.bf16.mxu1 %v1432_v0  ;;  %1103 = vmatprep.mubr.msk.bf16.mxu1 %vm1433_vm0, %v1432_v0  ;;  %v142_v1 = vld [vmem:[%s1584_s3] sm:$0xf]  ;;  %v1153_v2 = vld [vmem:[#allocation7 + $0x8] ss:$0 sps:$4 sm:$0xff]   ;;  %v141_v4 = vld [vmem:[#allocation5] sm:$0xf] }
  0x56   :  { %v149_v3 = vsel %vm147_vm1, %v142_v1, 0  ;;  %v205_v5 = vsel %vm147_vm1, %v1153_v2, 0  ;;  %v1155_v6 = vld [vmem:[#allocation8 + $0x74] ss:$8 sps:$4 sm:$0xff]   ;;  %v1157_v7 = vld [vmem:[#allocation8 + $0x70] ss:$8 sps:$4 sm:$0xff]  }
  0x57   :  { %1102 = vmatpush3.bf16.msra.mxu1 %v149_v3  ;;  %v1158_v8 = vld [vmem:[#allocation8 + $0x64] ss:$8 sps:$4 sm:$0xff]   ;;  %365 = vmatprep.subr.bf16.mxu0 %v1155_v6  ;;  %v1154_v9 = vld [vmem:[#allocation7] sm:$0xff]   ;;  %v1160_v10 = vld [vmem:[#allocation8 + $0x60] ss:$8 sps:$4 sm:$0xff]   ;;  %vm200_vm3 = vcmask 195584  }
  0x58   :  { %1107 = vmatprep.subr.bf16.mxu1 %v1432_v0  ;;  %366 = vmatpush1.bf16.msra.mxu0 %v1157_v7  ;;  %v1161_v11 = vld [vmem:[#allocation8 + $0x54] ss:$8 sps:$4 sm:$0xff]   ;;  %v137_v12 = vld [vmem:[#allocation2] sm:$0xf]  ;;  %v1163_v13 = vld [vmem:[#allocation8 + $0x50] ss:$8 sps:$4 sm:$0xff]  }
  0x59   :  { %367 = vmatprep.subr.bf16.mxu0 %v1158_v8  ;;  %v1164_v14 = vld [vmem:[#allocation8 + $0x44] ss:$8 sps:$4 sm:$0xff]   ;;  %v1166_v15 = vld [vmem:[#allocation8 + $0x40] ss:$8 sps:$4 sm:$0xff]   ;;  %v1167_v16 = vld [vmem:[#allocation8 + $0x34] ss:$8 sps:$4 sm:$0xff]  }
  0x5a   :  { %1104 = vmatmul.mubr.msk.bf16.vlgmr.msra.gmra.mxu1 %vm143_vm2, %v141_v4  ;;  %v1169_v17 = vld [vmem:[#allocation8 + $0x30] ss:$8 sps:$4 sm:$0xff]   ;;  %v1170_v18 = vld [vmem:[#allocation8 + $0x24] ss:$8 sps:$4 sm:$0xff]   ;;  %v1172_v19 = vld [vmem:[#allocation8 + $0x20] ss:$8 sps:$4 sm:$0xff]  }
  0x5b   :  { %1108 = vmatpush3.bf16.msra.mxu1 %v205_v5  ;;  %1111 = vmatprep.mubr.msk.bf16.mxu1 %vm1433_vm0, %v1432_v0  ;;  %v1173_v20 = vld [vmem:[#allocation8 + $0x14] ss:$8 sps:$4 sm:$0xff]   ;;  %v1175_v21 = vld [vmem:[#allocation8 + $0x10] ss:$8 sps:$4 sm:$0xff]   ;;  %v1176_v22 = vld [vmem:[#allocation8 + $0x4] ss:$8 sps:$4 sm:$0xff]  }
  0x5c   :  { %1109 = vmatprep.subr.bf16.mxu1 %v1432_v0  ;;  %368 = vmatpush1.bf16.msra.mxu0 %v1160_v10  ;;  %v1178_v23 = vld [vmem:[#allocation8] ss:$8 sps:$4 sm:$0xff]   ;;  %v1434_v24 = vmov 0   ;;  %v1179_v25 = vld [vmem:[#allocation10 + $0x70] ss:$8 sps:$4 sm:$0xff]   ;;  %s1435_s29 = smov 127  }
  0x5d   :  { %369 = vmatprep.subr.bf16.mxu0 %v1161_v11  ;;  %397 = vmatprep.mubr.bf16.mxu0 %v1434_v24  ;;  %v1181_v26 = vld [vmem:[#allocation10 + $0x74] ss:$8 sps:$4 sm:$0xff]   ;;  %v1184_v27 = vld [vmem:[#allocation10 + $0x64] ss:$8 sps:$4 sm:$0xff]   ;;  %v1182_v28 = vld [vmem:[#allocation10 + $0x60] ss:$8 sps:$4 sm:$0xff]  }
  0x5e   :  { %1151 = vset.pattern.permute.xlu1 %v1434_v24  ;;  %1152 = vset.pattern.permute.xlu0 %v1434_v24  ;;  %v1187_v29 = vld [vmem:[#allocation10 + $0x54] ss:$8 sps:$4 sm:$0xff]   ;;  %v1185_v30 = vld [vmem:[#allocation10 + $0x50] ss:$8 sps:$4 sm:$0xff]   ;;  %v1190_v31 = vld [vmem:[#allocation10 + $0x44] ss:$8 sps:$4 sm:$0xff]  }
  0x5f   :  { %1110 = vmatpush3.bf16.msra.mxu1 %v1154_v9  ;;  %v1188_v32 = vld [vmem:[#allocation10 + $0x40] ss:$8 sps:$4 sm:$0xff]   ;;  %v1193_v33 = vld [vmem:[#allocation10 + $0x34] ss:$8 sps:$4 sm:$0xff]   ;;  %v1191_v34 = vld [vmem:[#allocation10 + $0x30] ss:$8 sps:$4 sm:$0xff]  }
  0x60   :  { %370 = vmatpush1.bf16.msra.mxu0 %v1163_v13  ;;  %614 = vmatprep.subr.bf16.mxu1 %v1181_v26  ;;  %v1196_v35 = vld [vmem:[#allocation10 + $0x24] ss:$8 sps:$4 sm:$0xff]   ;;  %v1194_v36 = vld [vmem:[#allocation10 + $0x20] ss:$8 sps:$4 sm:$0xff]   ;;  %v1199_v37 = vld [vmem:[#allocation10 + $0x14] ss:$8 sps:$4 sm:$0xff]  }
  0x61   :  { %371 = vmatprep.subr.bf16.mxu0 %v1164_v14  ;;  %v1197_v38 = vld [vmem:[#allocation10 + $0x10] ss:$8 sps:$4 sm:$0xff]   ;;  %v1202_v39 = vld [vmem:[#allocation10 + $0x4] ss:$8 sps:$4 sm:$0xff]   ;;  %v1200_v40 = vld [vmem:[#allocation10] ss:$8 sps:$4 sm:$0xff]  }
  0x62   :  { %1112 = vmatmul.mubr.msk.bf16.vlgmr.msra.gmra.mxu1 %vm200_vm3, %v137_v12  ;;  %v1205_v41 = vld [vmem:[#allocation10 + $0xf4] ss:$8 sps:$4 sm:$0xff]   ;;  %v1203_v42 = vld [vmem:[#allocation10 + $0xf0] ss:$8 sps:$4 sm:$0xff]   ;;  %v1208_v43 = vld [vmem:[#allocation10 + $0xe4] ss:$8 sps:$4 sm:$0xff]  }
  0x63   :  { %615 = vmatpush1.bf16.msra.mxu1 %v1179_v25  ;;  %v1206_v44 = vld [vmem:[#allocation10 + $0xe0] ss:$8 sps:$4 sm:$0xff]   ;;  %v1211_v45 = vld [vmem:[#allocation10 + $0xd4] ss:$8 sps:$4 sm:$0xff]   ;;  %v1209_v46 = vld [vmem:[#allocation10 + $0xd0] ss:$8 sps:$4 sm:$0xff]  }
  0x64   :  { %372 = vmatpush1.bf16.msra.mxu0 %v1166_v15  ;;  %616 = vmatprep.subr.bf16.mxu1 %v1184_v27  ;;  %v1214_v47 = vld [vmem:[#allocation10 + $0xc4] ss:$8 sps:$4 sm:$0xff]   ;;  %v1212_v48 = vld [vmem:[#allocation10 + $0xc0] ss:$8 sps:$4 sm:$0xff]   ;;  %v1217_v49 = vld [vmem:[#allocation10 + $0xb4] ss:$8 sps:$4 sm:$0xff]  }
  0x65   :  { %373 = vmatprep.subr.bf16.mxu0 %v1167_v16  ;;  %v1215_v50 = vld [vmem:[#allocation10 + $0xb0] ss:$8 sps:$4 sm:$0xff]   ;;  %v1220_v51 = vld [vmem:[#allocation10 + $0xa4] ss:$8 sps:$4 sm:$0xff]   ;;  %v1218_v52 = vld [vmem:[#allocation10 + $0xa0] ss:$8 sps:$4 sm:$0xff]  }
  0x66   :  { %v990_v58 = vld [vmem:[%s1585_s4] ss:$0 sm:$0xff]  ;;  %v1223_v3 = vld [vmem:[#allocation10 + $0x94] ss:$8 sps:$4 sm:$0xff]   ;;  %v1221_v4 = vld [vmem:[#allocation10 + $0x90] ss:$8 sps:$4 sm:$0xff]  }
  0x67   :  { %617 = vmatpush1.bf16.msra.mxu1 %v1182_v28  ;;  %v1226_v5 = vld [vmem:[#allocation10 + $0x84] ss:$8 sps:$4 sm:$0xff]   ;;  %v1224_v6 = vld [vmem:[#allocation10 + $0x80] ss:$8 sps:$4 sm:$0xff]   ;;  %v1227_v7 = vld [vmem:[#allocation11 + $0x78] sm:$0xff]   ;;  %vm951_vm4 = vcmask 39936  }
  0x68   :  { %374 = vmatpush1.bf16.msra.mxu0 %v1169_v17  ;;  %618 = vmatprep.subr.bf16.mxu1 %v1187_v29  ;;  %v1228_v8 = vld [vmem:[#allocation11 + $0x38] sm:$0xff]   ;;  %v1229_v9 = vld [vmem:[#allocation11 + $0x70] sm:$0xff]   ;;  %v1231_v11 = vld [vmem:[#allocation11 + $0x68] sm:$0xff]  }
  0x69   :  { %375 = vmatprep.subr.bf16.mxu0 %v1170_v18  ;;  %v1230_v10 = vld [vmem:[#allocation11 + $0x30] sm:$0xff]   ;;  %v1232_v12 = vld [vmem:[#allocation11 + $0x28] sm:$0xff]   ;;  %v1233_v13 = vld [vmem:[#allocation11 + $0x60] sm:$0xff]  }
  0x6a   :  { %v1234_v14 = vld [vmem:[#allocation11 + $0x20] sm:$0xff]   ;;  %v1235_v15 = vld [vmem:[#allocation11 + $0x58] sm:$0xff]   ;;  %v1237_v17 = vld [vmem:[#allocation11 + $0x50] sm:$0xff]  }
  0x6b   :  { %619 = vmatpush1.bf16.msra.mxu1 %v1185_v30  ;;  %v1236_v16 = vld [vmem:[#allocation11 + $0x18] sm:$0xff]   ;;  %v1238_v18 = vld [vmem:[#allocation11 + $0x10] sm:$0xff]  }
  0x6c   :  { %376 = vmatpush1.bf16.msra.mxu0 %v1172_v19  ;;  %620 = vmatprep.subr.bf16.mxu1 %v1190_v31  ;;  %v275_v19 = vlaneseq }
  0x6d   :  { %377 = vmatprep.subr.bf16.mxu0 %v1173_v20 }
  0x6e   :  { %v276_v20 = vshrl.u32 %v275_v19, 7 }
  0x6f   :  { %621 = vmatpush1.bf16.msra.mxu1 %v1188_v32 }
  0x70   :  { %378 = vmatpush1.bf16.msra.mxu0 %v1175_v21  ;;  %622 = vmatprep.subr.bf16.mxu1 %v1193_v33  ;;  %v277_v21 = vsub.s32 0, %v276_v20 }
  0x71   :  { %379 = vmatprep.subr.bf16.mxu0 %v1176_v22  ;;  %v273_v22 = vld [vmem:[%s1587_s6] sm:$0x3] }
  0x72   :  { %v278_v24 = vrot.slane %v273_v22, %v277_v21 }
  0x73   :  { %623 = vmatpush1.bf16.msra.mxu1 %v1191_v34 }
  0x74   :  { %380 = vmatpush1.bf16.msra.mxu0 %v1178_v23  ;;  %624 = vmatprep.subr.bf16.mxu1 %v1196_v35  ;;  %v281_v23 = vsub.s32 1, %v276_v20 }
  0x75   :  { %1070 = vmatprep.subr.bf16.mxu0 %v1227_v7  ;;  %v1056_v7 = vld [vmem:[%s1593_s12] ss:$0 sm:$0xff] }
  0x76   :  { %v282_v25 = vrot.slane %v273_v22, %v281_v23 }
  0x77   :  { %625 = vmatpush1.bf16.msra.mxu1 %v1194_v36  ;;  %v1239_v36 = vld [vmem:[#allocation11 + $0x48] sm:$0xff]  }
  0x78   :  { %626 = vmatprep.subr.bf16.mxu1 %v1199_v37  ;;  %v1240_v37 = vld [vmem:[#allocation11 + $0x8] sm:$0xff]  }
  0x7b   :  { %627 = vmatpush1.bf16.msra.mxu1 %v1197_v38  ;;  %v1241_v38 = vld [vmem:[#allocation11 + $0x40] sm:$0xff]  }
  0x7c   :  { %628 = vmatprep.subr.bf16.mxu1 %v1202_v39  ;;  %v1242_v39 = vld [vmem:[#allocation11] sm:$0xff]  }
  0x7f   :  { %629 = vmatpush1.bf16.msra.mxu1 %v1200_v40  ;;  %v442_v40 = vld [vmem:[%s1589_s8] sm:$0x3] }
  0x80   :  { %630 = vmatprep.subr.bf16.mxu1 %v1205_v41  ;;  %v447_v41 = vrot.slane %v442_v40, %v277_v21 }
  0x83   :  { %631 = vmatpush2.bf16.msra.mxu1 %v1203_v42  ;;  %v451_v42 = vrot.slane %v442_v40, %v281_v23 }
  0x84   :  { %632 = vmatprep.subr.bf16.mxu1 %v1208_v43 }
  0x87   :  { %633 = vmatpush2.bf16.msra.mxu1 %v1206_v44 }
  0x88   :  { %634 = vmatprep.subr.bf16.mxu1 %v1211_v45 }
  0x8b   :  { %635 = vmatpush2.bf16.msra.mxu1 %v1209_v46 }
  0x8c   :  { %636 = vmatprep.subr.bf16.mxu1 %v1214_v47 }
  0x8f   :  { %637 = vmatpush2.bf16.msra.mxu1 %v1212_v48 }
  0x90   :  { %638 = vmatprep.subr.bf16.mxu1 %v1217_v49 }
  0x93   :  { %639 = vmatpush2.bf16.msra.mxu1 %v1215_v50 }
  0x94   :  { %640 = vmatprep.subr.bf16.mxu1 %v1220_v51 }
  0x97   :  { %641 = vmatpush2.bf16.msra.mxu1 %v1218_v52  ;;  %v1243_v52 = vld [vmem:[#allocation13 + $0x38] sm:$0xff]  }
  0x98   :  { %642 = vmatprep.subr.bf16.mxu1 %v1223_v3 }
  0x9b   :  { %643 = vmatpush2.bf16.msra.mxu1 %v1221_v4 }
  0x9c   :  { %644 = vmatprep.subr.bf16.mxu1 %v1226_v5 }
  0x9f   :  { %645 = vmatpush2.bf16.msra.mxu1 %v1224_v6 }
 0x11a   :  { %v185_v53 = vpop.f32.mrf.mxu1 }
 0x11c   :  { %v1105_v54 = vpop.f32.mrf.mxu1 }
 0x11d   :  { %v1244_v54 = vld [vmem:[#allocation13 + $0x30] sm:$0xff]  }
 0x11e   :  { %v188_v55 = vpop.f32.mrf.mxu1 }
 0x11f   :  { %v1245_v55 = vld [vmem:[#allocation13 + $0x28] sm:$0xff]  }
 0x120   :  { %v1106_v56 = vpop.f32.mrf.mxu1 }
 0x121   :  { %v1246_v56 = vld [vmem:[#allocation13 + $0x20] sm:$0xff]  }
 0x122   :  { %v241_v57 = vpop.f32.mrf.mxu1 }
 0x123   :  { %v242_v59 = vadd.f32 %v241_v57, %v185_v53  ;;  %v1247_v57 = vld [vmem:[#allocation13 + $0x18] sm:$0xff]  }
 0x124   :  { %v1113_v60 = vpop.f32.mrf.mxu1 }
 0x125   :  { %v254_v61 = vadd.f32 %v990_v58, %v242_v59  ;;  %v1248_v58 = vld [vmem:[#allocation13 + $0x10] sm:$0xff]   ;;  %v1249_v59 = vld [vmem:[#allocation13 + $0x8] sm:$0xff]   ;;  %v1250_v60 = vld [vmem:[#allocation13] sm:$0xff]  }
 0x126   :  { %v244_v62 = vpop.f32.mrf.mxu1 }
 0x127   :  { %v255_v63 = vmax.f32 %v254_v61, 0.0  ;;  %v1039_v62 = vld [vmem:[%s1591_s10] ss:$0 sm:$0xff]  ;;  %s1436_s10 = smov [#allocation14]  }
 0x128   :  { %v1114_v1 = vpop.f32.mrf.mxu1  ;;  %s974_s12 = sshll.u32 %s1436_s10, 4  ;;  %s975_s12 = int_to_ptr.vmem [resolvable:$true] %s974_s12 }
 0x129   :  { %v256_v2 = vpack.c.bf16 %v255_v63, %v255_v63  ;;  %s1391_s30 = scalar_lea.vmem %s975_s12, 128  ;;  %p1396_p8 = scmp.lt.s32.totalorder %s975_s12, %s975_s12 }
 0x12a   :  { %p1392_p7 = scmp.ne.s32.totalorder %s975_s12, %s1391_s30  ;;  %p1397_p9 = scmp.lt.s32.totalorder %s1391_s30, %s1391_s30 }
 0x12b   :  { %398 = vmatmul.mubr.bf16.vlgmr.msra.gmra.mxu0 %v256_v2 }
 0x12c   :  { %1071 = vmatpush3.bf16.msra.mxu0 %v1228_v8  ;;  %p1398_p10 = por %p1397_p9, %p1396_p8 }
 0x12d   :  { %1072 = vmatprep.subr.bf16.mxu0 %v1229_v9 }
 0x12e   :  { %p1399_p11 = pnand %p1398_p10, %p1392_p7 }
 0x130   :  { %1073 = vmatpush3.bf16.msra.mxu0 %v1230_v10 }
 0x131   :  { %1074 = vmatprep.subr.bf16.mxu0 %v1231_v11 }
 0x134   :  { %1075 = vmatpush3.bf16.msra.mxu0 %v1232_v12 }
 0x135   :  { %1076 = vmatprep.subr.bf16.mxu0 %v1233_v13 }
 0x138   :  { %1077 = vmatpush3.bf16.msra.mxu0 %v1234_v14 }
 0x139   :  { %1078 = vmatprep.subr.bf16.mxu0 %v1235_v15 }
 0x13c   :  { %1079 = vmatpush3.bf16.msra.mxu0 %v1236_v16 }
 0x13d   :  { %1080 = vmatprep.subr.bf16.mxu0 %v1237_v17 }
 0x140   :  { %1081 = vmatpush3.bf16.msra.mxu0 %v1238_v18 }
 0x141   :  { %1082 = vmatprep.subr.bf16.mxu0 %v1239_v36 }
 0x144   :  { %1083 = vmatpush3.bf16.msra.mxu0 %v1240_v37 }
 0x145   :  { %1084 = vmatprep.subr.bf16.mxu0 %v1241_v38 }
 0x148   :  { %1085 = vmatpush3.bf16.msra.mxu0 %v1242_v39 }
 0x149   :  { %1115 = vmatprep.subr.bf16.mxu0 %v1432_v0 }
 0x1eb   :  { %v399_v26 = vpop.f32.mrf.mxu0 }
 0x1ec   :  { %v400_v27 = vadd.f32 %v399_v26, %v278_v24 }
 0x1ed   :  { %v401_v28 = vpop.f32.mrf.mxu0 }
 0x1ee   :  { %v402_v29 = vadd.f32 %v401_v28, %v282_v25  ;;  %v406_v30 = vmax.f32 %v400_v27, 0.0 }
 0x1ef   :  { %v403_v31 = vpop.f32.mrf.mxu0 }
 0x1f0   :  { %v407_v32 = vmax.f32 %v402_v29, 0.0  ;;  %v408_v35 = vpack.c.bf16 %v406_v30, %v406_v30 }
 0x1f1   :  { %v404_v33 = vpop.f32.mrf.mxu0 }
 0x1f2   :  { %v409_v34 = vpack.c.bf16 %v407_v32, %v407_v32 }
 0x1f4   :  { %646 = vmatprep.mubr.bf16.mxu1 %v409_v34 }
 0x1f5   :  { %647 = vmatmul.mubr.bf16.vlgmr.msra.gmra.mxu1 %v408_v35 }
 0x2b5   :  { %v648_v43 = vpop.f32.mrf.mxu1 }
 0x2b6   :  { %v649_v44 = vadd.f32 %v648_v43, %v447_v41 }
 0x2b7   :  { %v650_v45 = vpop.f32.mrf.mxu1 }
 0x2b8   :  { %v651_v46 = vadd.f32 %v650_v45, %v451_v42  ;;  %v655_v47 = vmax.f32 %v649_v44, 0.0 }
 0x2b9   :  { %v652_v48 = vpop.f32.mrf.mxu1 }
 0x2ba   :  { %v656_v49 = vmax.f32 %v651_v46, 0.0  ;;  %v657_v53 = vpack.c.bf16 %v655_v47, %v655_v47 }
 0x2bb   :  { %v653_v50 = vpop.f32.mrf.mxu1 }
 0x2bc   :  { %v658_v51 = vpack.c.bf16 %v656_v49, %v656_v49 }
 0x2be   :  { %826 = vmatprep.mubr.bf16.mxu0 %v658_v51 }
 0x2bf   :  { %827 = vmatmul.mubr.bf16.vlgmr.msra.gmra.mxu0 %v657_v53 }
 0x2c0   :  { %1116 = vmatpush3.bf16.msra.mxu0 %v1243_v52  ;;  %1131 = vmatprep.mubr.msk.bf16.mxu0 %vm1433_vm0, %v1432_v0 }
 0x2c1   :  { %1117 = vmatprep.subr.bf16.mxu0 %v1432_v0 }
 0x2c4   :  { %1118 = vmatpush3.bf16.msra.mxu0 %v1244_v54 }
 0x2c5   :  { %1119 = vmatprep.subr.bf16.mxu0 %v1432_v0 }
 0x2c8   :  { %1120 = vmatpush3.bf16.msra.mxu0 %v1245_v55 }
 0x2c9   :  { %1121 = vmatprep.subr.bf16.mxu0 %v1432_v0 }
 0x2cc   :  { %1122 = vmatpush3.bf16.msra.mxu0 %v1246_v56 }
 0x2cd   :  { %1123 = vmatprep.subr.bf16.mxu0 %v1432_v0 }
 0x2d0   :  { %1124 = vmatpush3.bf16.msra.mxu0 %v1247_v57 }
 0x2d1   :  { %1125 = vmatprep.subr.bf16.mxu0 %v1432_v0 }
 0x2d4   :  { %1126 = vmatpush3.bf16.msra.mxu0 %v1248_v58 }
 0x2d5   :  { %1127 = vmatprep.subr.bf16.mxu0 %v1432_v0 }
 0x2d8   :  { %1128 = vmatpush3.bf16.msra.mxu0 %v1249_v59 }
 0x2d9   :  { %1129 = vmatprep.subr.bf16.mxu0 %v1432_v0 }
 0x2dc   :  { %1130 = vmatpush3.bf16.msra.mxu0 %v1250_v60 }
 0x37f   :  { %v1086_v61 = vpop.f32.mrf.mxu0 }
 0x381   :  { %v1087_v63 = vpop.f32.mrf.mxu0 }
 0x382   :  { %v1088_v1 = vadd.f32 %v1087_v63, %v1086_v61 }
 0x383   :  { %v1089_v2 = vpop.f32.mrf.mxu0 }
 0x384   :  { %v829_v3 = vadd.f32 %v1088_v1, %v1039_v62 }
 0x385   :  { %v1090_v4 = vpop.f32.mrf.mxu0 }
 0x386   :  { %v834_v5 = vmax.f32 %v829_v3, 0.0 }
 0x388   :  { %v835_v6 = vpack.c.bf16 %v834_v5, %v834_v5 }
 0x38a   :  { %1132 = vmatmul.mubr.bf16.vlgmr.msra.gmra.mxu0 %v835_v6 }
 0x44a   :  { %v941_v0 = vpop.f32.mrf.mxu0 }
 0x44b   :  { %v942_v8 = vadd.f32 %v1056_v7, %v941_v0 }
 0x44c   :  { %v1133_v9 = vpop.f32.mrf.mxu0 }
 0x44d   :  { %948 = vrot.lane.b32.xlu0 %v942_v8, %s1435_s29 }
 0x44e   :  { %v944_v10 = vpop.f32.mrf.mxu0 }
 0x450   :  { %v1134_v11 = vpop.f32.mrf.mxu0 }
 0x4bf   :  { %v949_v12 = vpop.permute.xlu0 %948 }
 0x4c0   :  { %v952_v13 = vsel %vm951_vm4, %v949_v12, 0.0 }
 0x4c1   :  { %953 = vadd.xlane.f32.xlu0 %v952_v13 }
 0x54a   :  { %v954_v14 = vpop.xlane.xlu0 %953 }
 0x54b   :  { %v955_v15 = vmul.f32 0.2, %v954_v14 }
 0x54d   :  { %v956_v16 = vsub.f32 %v942_v8, %v955_v15 }
 0x54f   :  { %959 = vperm.xlu1 %1151, %v956_v16  }
 0x5ca   :  { %v960_v17 = vpop.permute.xlu1 %959 }
 0x5cb   :  { %v962_v18 = vadd.f32 %v960_v17, %v942_v8 }
 0x5cd   :  { %964 = vrot.lane.b32.xlu1 %v962_v18, %s1435_s29 }
 0x63f   :  { %v965_v19 = vpop.permute.xlu1 %964 }
 0x640   :  { %967 = vst.msk [vmem:[#allocation14] sm:$0xff] %vm951_vm4, %v965_v19 }
 0x641   :  { %1402 = shalt.err (!%p1399_p11)
}
 0x642   :  { %977 = dma.vmem_to_hbm [thread:$0]  %s975_s12, 128, %s1594_s13, [#allocation4]  }
 0x643   :  { %1419 = dma.done.wait [#allocation4], 128  }
 0x644   :  { %1420 = vsyncadd [#allocation4], 4294967168 }
 0x645   :  { %981 = vsyncpa [#allocation3], 1 }
 0x646   :  { %982 = vsyncpa [#allocation6], 1 }
 0x647   :  { %983 = vsyncpa [#allocation9], 1 }
 0x648   :  { %984 = vsyncpa [#allocation12], 1 }
 0x649   :  { %985 = vsyncpa [#allocation4], 1 }

</bundles_post_ra>
